<compile_context>
chip_gen: v5e
topology: v5e:2x2
jax: 0.10.0
libtpu: 0.0.40
codegen_flags: <defaults>
</compile_context>

<pallas_src>
import jax
import jax.numpy as jnp
import numpy as np
from jax import lax
from jax.experimental import pallas as pl
from jax.experimental.pallas import tpu as pltpu

LN_EPS = 1e-5  # PyTorch nn.LayerNorm default


# ---------------------------------------------------------------------------
# Fused kernel:  out = LayerNorm(x + conn_tgt) * gamma + beta
# ---------------------------------------------------------------------------
def _add_norm_kernel(x_ref, c_ref, gb_ref, out_ref):
    # Block is (rows, E): rows on sublanes, embed on lanes (reduction = lanes).
    y = x_ref[...].astype(jnp.float32) + c_ref[...].astype(jnp.float32)
    e = y.shape[-1]
    inv_e = jnp.float32(1.0 / e)

    # One-pass mean/variance: both lane reductions issue back-to-back with no
    # dependency between them; no full-block `diff` intermediate.
    s1 = jnp.sum(y, axis=-1, keepdims=True)
    s2 = jnp.sum(y * y, axis=-1, keepdims=True)
    mu = s1 * inv_e
    var = jnp.maximum(s2 * inv_e - mu * mu, 0.0)

    y_hat = (y - mu) * lax.rsqrt(var + jnp.float32(LN_EPS))  # EUP rsqrt

    gamma = gb_ref[0:1, :].astype(jnp.float32)               # (1, E) broadcast
    beta = gb_ref[1:2, :].astype(jnp.float32)
    out_ref[...] = (y_hat * gamma + beta).astype(out_ref.dtype)


# ---------------------------------------------------------------------------
# Wrapper
# ---------------------------------------------------------------------------
def _num_tensorcores() -> int:
    """Best-effort trace-time TensorCore count (v7x has 2/chip)."""
    try:
        info = pltpu.get_tpu_info()
        for attr in ("num_cores", "core_count", "tensorcore_count",
                     "num_tensorcores"):
            v = getattr(info, attr, None)
            if isinstance(v, int) and v > 0:
                return v
    except Exception:
        pass
    try:
        v = getattr(jax.devices()[0], "num_cores", None)
        if isinstance(v, int) and v > 0:
            return v
    except Exception:
        pass
    return 1


def _sublane_multiple(dtype) -> int:
    # Minimum legal sublane tile per dtype: 8 (f32), 16 (bf16), 32 (int8/fp8).
    itemsize = jnp.dtype(dtype).itemsize
    return max(8, 32 // max(1, itemsize))


def add_and_norm(x, conn_tgt, gamma, beta):
    """Fused residual-add + LayerNorm over the last dim (Pallas TPU).

    x, conn_tgt : [..., E]   (any leading shape; flattened to rows internally)
    gamma, beta : [E]        LayerNorm affine parameters.
    Dropout is identity (eval-mode semantics).
    """
    assert x.shape == conn_tgt.shape
    orig_shape = x.shape
    E = orig_shape[-1]
    assert gamma.shape == (E,) and beta.shape == (E,)

    x2 = x.reshape(-1, E)
    c2 = conn_tgt.reshape(-1, E)
    N = x2.shape[0]

    itemsize = jnp.dtype(x.dtype).itemsize
    sub = _sublane_multiple(x.dtype)

    # Per-ref block budget ~2 MiB: (2 inputs + 1 output) x 2 pipeline buffers
    # stays ~12 MiB, safely inside the tightest scoped-VMEM default (v7x),
    # while ~512+ rows per block (for E~1024 f32) is enough to sit near the
    # HBM roofline.
    MAX_BLOCK_BYTES = 2 * 1024 * 1024
    bytes_per_row = max(1, E * itemsize)
    cap_rows = max(sub, (MAX_BLOCK_BYTES // bytes_per_row) // sub * sub)

    if N <= cap_rows:
        # Whole problem fits in one block: launch/overhead-bound regime.
        # Split 2-way only when there are >=2 TensorCores AND each core gets
        # a non-trivial, legally-tiled block.
        if (_num_tensorcores() >= 2 and N % (2 * sub) == 0 and N // 2 >= 64):
            nblk, rows = 2, N // 2
        else:
            nblk, rows = 1, N           # full-array block (always legal)
    else:
        # Row-tiled grid for large N: prefer an exact divisor of N so every
        # block is full; otherwise Pallas masks the final partial block.
        rows = cap_rows
        t = rows
        while t >= sub and N % t != 0:
            t -= sub
        if t >= sub:
            rows = t
        nblk = pl.cdiv(N, rows)

    gb = jnp.stack([gamma, beta], axis=0)   # (2, E): single tiny param ref

    out = pl.pallas_call(
        _add_norm_kernel,
        out_shape=jax.ShapeDtypeStruct((N, E), x.dtype),
        grid=(nblk,),
        in_specs=[
            pl.BlockSpec((rows, E), lambda i: (i, 0)),
            pl.BlockSpec((rows, E), lambda i: (i, 0)),
            pl.BlockSpec((2, E), lambda i: (0, 0)),
        ],
        out_specs=pl.BlockSpec((rows, E), lambda i: (i, 0)),
        compiler_params=pltpu.CompilerParams(
            dimension_semantics=("parallel",),
            vmem_limit_bytes=32 * 1024 * 1024,
        ),
    )(x2, c2, gb)

    return out.reshape(orig_shape)


# ---------------------------------------------------------------------------
# Pure-JAX reference (correctness check)
# ---------------------------------------------------------------------------
def _ref_add_and_norm(x, conn_tgt, gamma, beta):
    y = x + conn_tgt
    mu = jnp.mean(y, axis=-1, keepdims=True)
    var = jnp.mean((y - mu) ** 2, axis=-1, keepdims=True)
    return ((y - mu) / jnp.sqrt(var + LN_EPS)) * gamma + beta
    # dropout: identity in eval mode


# ---------------------------------------------------------------------------
if __name__ == "__main__":
    key = jax.random.PRNGKey(0)
    k_x, k_c, k_g, k_b = jax.random.split(key, 4)

    B, T, E = 2, 8, 32   # batch=2, seq=8, embed=32
    x = jax.random.normal(k_x, (B, T, E), jnp.float32)
    conn_tgt = jax.random.normal(k_c, (B, T, E), jnp.float32)

    # Non-trivial affine params to exercise the full LayerNorm path
    # (PyTorch default init would be gamma=1, beta=0).
    gamma = 1.0 + 0.1 * jax.random.normal(k_g, (E,), jnp.float32)
    beta = 0.1 * jax.random.normal(k_b, (E,), jnp.float32)

    # TODO(synk): dropout is implemented as identity (eval-mode); training-mode
    # dropout would need pltpu.prng_seed/prng_random_bits inside the kernel.
    out = add_and_norm(x, conn_tgt, gamma, beta)
    out = jax.block_until_ready(out)

    ref = _ref_add_and_norm(x, conn_tgt, gamma, beta)
    np.testing.assert_allclose(np.asarray(out), np.asarray(ref),
                               rtol=1e-5, atol=1e-5)

    print("KERNEL_OK")
</pallas_src>

<mosaic_0001>
module attributes {stable_mosaic.version = 11 : i64} {
  func.func @_add_norm_kernel(%arg0: i32, %arg1: memref<16x32xf32, #tpu.memory_space<vmem>>, %arg2: memref<16x32xf32, #tpu.memory_space<vmem>>, %arg3: memref<2x32xf32, #tpu.memory_space<vmem>>, %arg4: memref<16x32xf32, #tpu.memory_space<vmem>>) attributes {dimension_semantics = [#tpu.dimension_semantics<parallel>], iteration_bounds = array<i64: 1>, scalar_prefetch = 0 : i64, scratch_operands = 0 : i64, tpu.core_type = #tpu.core_type<tc>, window_params = [{transform_indices = @transform_0, window_bounds = array<i64: 16, 32>}, {transform_indices = @transform_1, window_bounds = array<i64: 16, 32>}, {pipeline_mode = #tpu.pipeline_mode<synchronous>, transform_indices = @transform_2, window_bounds = array<i64: 2, 32>}, {transform_indices = @transform_3, window_bounds = array<i64: 16, 32>}]} {
    %c0 = arith.constant 0 : index
    %c0_0 = arith.constant 0 : index
    %0 = vector.load %arg1[%c0, %c0_0] : memref<16x32xf32, #tpu.memory_space<vmem>>, vector<16x32xf32>
    %c0_1 = arith.constant 0 : index
    %c0_2 = arith.constant 0 : index
    %1 = vector.load %arg2[%c0_1, %c0_2] : memref<16x32xf32, #tpu.memory_space<vmem>>, vector<16x32xf32>
    %2 = arith.addf %0, %1 : vector<16x32xf32>
    %cst = arith.constant dense<0.000000e+00> : vector<16xf32>
    %3 = vector.multi_reduction <add>, %2, %cst [1] : vector<16x32xf32> to vector<16xf32>
    %4 = vector.shape_cast %3 : vector<16xf32> to vector<16x1xf32>
    %5 = arith.mulf %2, %2 : vector<16x32xf32>
    %cst_3 = arith.constant dense<0.000000e+00> : vector<16xf32>
    %6 = vector.multi_reduction <add>, %5, %cst_3 [1] : vector<16x32xf32> to vector<16xf32>
    %7 = vector.shape_cast %6 : vector<16xf32> to vector<16x1xf32>
    %cst_4 = arith.constant 3.125000e-02 : f32
    %8 = vector.broadcast %cst_4 : f32 to vector<16x1xf32>
    %9 = arith.mulf %4, %8 : vector<16x1xf32>
    %cst_5 = arith.constant 3.125000e-02 : f32
    %10 = vector.broadcast %cst_5 : f32 to vector<16x1xf32>
    %11 = arith.mulf %7, %10 : vector<16x1xf32>
    %12 = arith.mulf %9, %9 : vector<16x1xf32>
    %13 = arith.subf %11, %12 : vector<16x1xf32>
    %cst_6 = arith.constant 0.000000e+00 : f32
    %14 = vector.broadcast %cst_6 : f32 to vector<16x1xf32>
    %15 = arith.maximumf %13, %14 : vector<16x1xf32>
    %16 = vector.broadcast %9 : vector<16x1xf32> to vector<16x32xf32>
    %17 = arith.subf %2, %16 : vector<16x32xf32>
    %cst_7 = arith.constant 9.99999974E-6 : f32
    %18 = vector.broadcast %cst_7 : f32 to vector<16x1xf32>
    %19 = arith.addf %15, %18 : vector<16x1xf32>
    %20 = math.rsqrt %19 : vector<16x1xf32>
    %21 = vector.broadcast %20 : vector<16x1xf32> to vector<16x32xf32>
    %22 = arith.mulf %17, %21 : vector<16x32xf32>
    %c0_8 = arith.constant 0 : index
    %c0_9 = arith.constant 0 : index
    %23 = vector.load %arg3[%c0_8, %c0_9] : memref<2x32xf32, #tpu.memory_space<vmem>>, vector<1x32xf32>
    %c1 = arith.constant 1 : index
    %c0_10 = arith.constant 0 : index
    %24 = vector.load %arg3[%c1, %c0_10] : memref<2x32xf32, #tpu.memory_space<vmem>>, vector<1x32xf32>
    %25 = vector.broadcast %23 : vector<1x32xf32> to vector<16x32xf32>
    %26 = arith.mulf %22, %25 : vector<16x32xf32>
    %27 = vector.broadcast %24 : vector<1x32xf32> to vector<16x32xf32>
    %28 = arith.addf %26, %27 : vector<16x32xf32>
    %c0_11 = arith.constant 0 : index
    %c0_12 = arith.constant 0 : index
    %29 = vector.load %arg4[%c0_11, %c0_12] : memref<16x32xf32, #tpu.memory_space<vmem>>, vector<16x32xf32>
    tpu.vector_store %arg4[%c0_11, %c0_12], %28 {strides = array<i32>} : memref<16x32xf32, #tpu.memory_space<vmem>>, vector<16x32xf32>,
    return
  }
  func.func @transform_0(%arg0: i32) -> (i32, i32) {
    %c0_i32 = arith.constant 0 : i32
    %c0_i32_0 = arith.constant 0 : i32
    return %arg0, %c0_i32 : i32, i32
  }
  func.func @transform_1(%arg0: i32) -> (i32, i32) {
    %c0_i32 = arith.constant 0 : i32
    %c0_i32_0 = arith.constant 0 : i32
    return %arg0, %c0_i32 : i32, i32
  }
  func.func @transform_2(%arg0: i32) -> (i32, i32) {
    %c0_i32 = arith.constant 0 : i32
    %c0_i32_0 = arith.constant 0 : i32
    %c0_i32_1 = arith.constant 0 : i32
    return %c0_i32, %c0_i32_0 : i32, i32
  }
  func.func @transform_3(%arg0: i32) -> (i32, i32) {
    %c0_i32 = arith.constant 0 : i32
    %c0_i32_0 = arith.constant 0 : i32
    return %arg0, %c0_i32 : i32, i32
  }
}

</mosaic_0001>

<bundles_post_ra>
// kernel: tpu_custom_call.1
= control target key start
LH: loop header
LB: loop body
LE: loop exit
PB: predicated region body
PF: predicated region fallthrough
CT: control target
= control target key end

     0   :  { %8 = vsyncpa [#allocation3], 0  ;;  %s314_s0 = inlined_call_operand.hbm [shape: f32[16,32], index: 0, kind: input, shape index: {}]   ;;  %s315_s1 = inlined_call_operand.hbm [shape: f32[16,32], index: 1, kind: input, shape index: {}]   ;;  %s316_s2 = inlined_call_operand.hbm [shape: f32[2,32], index: 2, kind: input, shape index: {}]   ;;  %s317_s3 = inlined_call_operand.hbm [shape: f32[16,32], index: 3, kind: output, shape index: {}]  }
   0x1   :  { %9 = vsyncpa [#allocation6], 0 }
   0x2   :  { %10 = vsyncpa [#allocation4], 0  ;;  %s28_s14 = sshll.u32 %s315_s1, 4  ;;  %s261_s15 = smov [#allocation5]   ;;  %s29_s14 = int_to_ptr.hbm [resolvable:$true] %s28_s14 }
   0x3   :  { %s30_s16 = sshll.u32 %s261_s15, 4  ;;  %s15_s19 = sshll.u32 %s314_s0, 4  ;;  %s31_s16 = int_to_ptr.vmem [resolvable:$true] %s30_s16  ;;  %s16_s19 = int_to_ptr.hbm [resolvable:$true] %s15_s19 }
   0x4   :  { %s262_s20 = smov 128   ;;  %s263_s21 = smov 8  }
   0x5   :  { %36 = dma.hbm_to_vmem [thread:$0]  %s29_s14, 256, %s31_s16, [#allocation6], %s262_s20, %s262_s20, %s263_s21  }
   0x6   :  { %s264_s22 = smov [#allocation2]   ;;  %s42_s1 = sshll.u32 %s316_s2, 4  ;;  %s43_s1 = int_to_ptr.hbm [resolvable:$true] %s42_s1 }
   0x7   :  { %s17_s23 = sshll.u32 %s264_s22, 4  ;;  %s265_s0 = smov [#allocation7]   ;;  %s18_s23 = int_to_ptr.vmem [resolvable:$true] %s17_s23 }
   0x8   :  { %23 = dma.hbm_to_vmem [thread:$0]  %s16_s19, 256, %s18_s23, [#allocation3], %s262_s20, %s262_s20, %s263_s21  }
   0x9   :  { %s44_s26 = sshll.u32 %s265_s0, 4  ;;  %s45_s26 = int_to_ptr.vmem [resolvable:$true] %s44_s26 }
   0xa   :  { %47 = dma.hbm_to_vmem [thread:$0]  %s43_s1, 32, %s45_s26, [#allocation6]  }
   0xb   :  { %255 = dma.done.wait [#allocation3], 256  }
   0xc   :  { %256 = vsyncadd [#allocation3], 4294967040 }
   0xd   :  { %257 = dma.done.wait [#allocation6], 288  }
   0xe   :  { %258 = vsyncadd [#allocation6], 4294967008  ;;  %v60_v0 = vld [vmem:[#allocation2] sm:$0xff]  ;;  %v62_v1 = vld [vmem:[#allocation5] sm:$0xff]  ;;  %vm66_vm0 = vcmask 261120   ;;  %s266_s2 = smov [#allocation8]  }
   0xf   :  { %v61_v2 = vld [vmem:[#allocation2 + $0x8] sm:$0xff]  ;;  %v64_v3 = vadd.f32 %v62_v1, %v60_v0  ;;  %v63_v4 = vld [vmem:[#allocation5 + $0x8] sm:$0xff]  ;;  %v153_v37 = vld [vmem:[#allocation7] ss:$0 sm:$0xff]  ;;  %s131_s27 = sshll.u32 %s266_s2, 4  ;;  %s133_s30 = sshll.u32 %s317_s3, 4  ;;  %s132_s27 = int_to_ptr.vmem [resolvable:$true] %s131_s27  ;;  %s134_s30 = int_to_ptr.hbm [resolvable:$true] %s133_s30 }
  0x10   :  { %v65_v7 = vadd.f32 %v63_v4, %v61_v2  ;;  %v154_v41 = vld [vmem:[#allocation7 + $0x1] ss:$0 sm:$0xff] }
  0x11   :  { %v67_v5 = vsel %vm66_vm0, %v64_v3, 0.0  ;;  %v73_v6 = vmul.f32 %v64_v3, %v64_v3 }
  0x12   :  { %68 = vadd.xlane.f32.xlu0 %v67_v5  ;;  %v74_v9 = vmul.f32 %v65_v7, %v65_v7  ;;  %v70_v10 = vsel %vm66_vm0, %v65_v7, 0.0 }
  0x13   :  { %v75_v8 = vsel %vm66_vm0, %v73_v6, 0.0 }
  0x14   :  { %76 = vadd.xlane.f32.xlu1 %v75_v8  ;;  %v78_v11 = vsel %vm66_vm0, %v74_v9, 0.0 }
  0x1a   :  { %71 = vadd.xlane.f32.xlu0 %v70_v10 }
  0x1c   :  { %79 = vadd.xlane.f32.xlu1 %v78_v11 }
  0x85   :  { %v69_v12 = vpop.xlane.xlu0 %68 }
  0x86   :  { %v81_v13 = vmul.f32 0.03125, %v69_v12 }
  0x87   :  { %v77_v14 = vpop.xlane.xlu1 %76 }
  0x88   :  { %v85_v15 = vmul.f32 %v81_v13, %v81_v13  ;;  %v83_v16 = vmul.f32 0.03125, %v77_v14  ;;  %v91_v35 = vsub.f32 %v64_v3, %v81_v13 }
  0x8a   :  { %v87_v17 = vsub.f32 %v83_v16, %v85_v15 }
  0x8c   :  { %v89_v18 = vmax.f32 %v87_v17, 0.0 }
  0x8d   :  { %v72_v19 = vpop.xlane.xlu0 %71 }
  0x8e   :  { %v93_v20 = vadd.f32 1e-05, %v89_v18  ;;  %v82_v21 = vmul.f32 0.03125, %v72_v19 }
  0x8f   :  { %v80_v22 = vpop.xlane.xlu1 %79 }
  0x90   :  { %155 = vrsqrt.f32 %v93_v20  ;;  %v86_v23 = vmul.f32 %v82_v21, %v82_v21  ;;  %v84_v24 = vmul.f32 0.03125, %v80_v22  ;;  %vm101_vm2 = vweird.f32 %v93_v20 }
  0x91   :  { %v92_v47 = vsub.f32 %v65_v7, %v82_v21 }
  0x92   :  { %v88_v25 = vsub.f32 %v84_v24, %v86_v23 }
  0x94   :  { %v90_v26 = vmax.f32 %v88_v25, 0.0 }
  0x96   :  { %v156_v27 = vpop.eup %155  ;;  %v94_v29 = vadd.f32 1e-05, %v90_v26 }
  0x97   :  { %v96_v28 = vmul.f32 %v156_v27, %v93_v20  ;;  %vm102_vm1 = vweird.f32 %v156_v27 }
  0x98   :  { %157 = vrsqrt.f32 %v94_v29  ;;  %vm103_vm3 = vmor %vm101_vm2, %vm102_vm1  ;;  %vm111_vm5 = vweird.f32 %v94_v29 }
  0x99   :  { %v97_v30 = vmul.f32 %v156_v27, %v96_v28 }
  0x9b   :  { %v98_v31 = vmul.f32 0.5, %v97_v30 }
  0x9d   :  { %v99_v32 = vsub.f32 1.5, %v98_v31 }
  0x9e   :  { %v158_v33 = vpop.eup %157 }
  0x9f   :  { %v100_v34 = vmul.f32 %v156_v27, %v99_v32  ;;  %v106_v36 = vmul.f32 %v158_v33, %v94_v29  ;;  %vm112_vm4 = vweird.f32 %v158_v33 }
  0xa0   :  { %vm113_vm6 = vmor %vm111_vm5, %vm112_vm4 }
  0xa1   :  { %v104_v38 = vsel %vm103_vm3, %v156_v27, %v100_v34  ;;  %v107_v40 = vmul.f32 %v158_v33, %v106_v36 }
  0xa2   :  { %v115_v39 = vmul.f32 %v104_v38, %v91_v35 }
  0xa3   :  { %v108_v42 = vmul.f32 0.5, %v107_v40 }
  0xa4   :  { %v120_v43 = vmul.f32 %v153_v37, %v115_v39 }
  0xa5   :  { %v109_v44 = vsub.f32 1.5, %v108_v42 }
  0xa6   :  { %v123_v45 = vadd.f32 %v154_v41, %v120_v43 }
  0xa7   :  { %v110_v46 = vmul.f32 %v158_v33, %v109_v44 }
  0xa8   :  { %125 = vst.msk [vmem:[#allocation8] sm:$0xff] %vm66_vm0, %v123_v45 }
  0xa9   :  { %v114_v48 = vsel %vm113_vm6, %v158_v33, %v110_v46 }
  0xaa   :  { %v116_v49 = vmul.f32 %v114_v48, %v92_v47 }
  0xac   :  { %v121_v50 = vmul.f32 %v153_v37, %v116_v49 }
  0xae   :  { %v124_v51 = vadd.f32 %v154_v41, %v121_v50 }
  0xb0   :  { %126 = vst.msk [vmem:[#allocation8 + $0x8] sm:$0xff] %vm66_vm0, %v124_v51 }
  0xb1   :  { %139 = dma.vmem_to_hbm [thread:$0]  %s132_s27, 256, %s134_s30, [#allocation4], %s262_s20, %s262_s20, %s263_s21  }
  0xb2   :  { %259 = dma.done.wait [#allocation4], 256  }
  0xb3   :  { %260 = vsyncadd [#allocation4], 4294967040 }
  0xb4   :  { %144 = vsyncpa [#allocation3], 1 }
  0xb5   :  { %145 = vsyncpa [#allocation6], 1 }
  0xb6   :  { %146 = vsyncpa [#allocation4], 1 }

</bundles_post_ra>
